<compile_context>
chip_gen: v6e
topology: v6e:2x2x1
jax: 0.10.0
libtpu: 0.0.40
codegen_flags: <defaults>
</compile_context>

<pallas_src>
import functools

import jax
import jax.numpy as jnp
from jax.experimental import pallas as pl
from jax.experimental.pallas import tpu as pltpu

EMB_SIZE = [2, 4, 8, 16, 64, 128]   # len == 6 -> output classes
HIDDEN = 512
EPS = 1e-5
NEG_BIG = -1e30


def _round_up(n, m):
    return (n + m - 1) // m * m


def _policy_kernel(x_ref, slab_ref, out_ref, *, pop_dim, k_in, num_pop,
                   r_bn2, r_w2t, r_emb, n_pad):
    B = x_ref.shape[0]

    # Packed per-sample input: lanes [0:pop_dim) are zero, then
    # [last_weights | last_loss | popularity-as-f32].
    x = x_ref[...]                                          # (B, k_in)
    # Exact for indices < 2^24 (num_pop is tiny).  NOTE: an out-of-range index
    # yields an all-zero one-hot row (silent zero embedding), unlike PyTorch.
    idx = x[:, k_in - 1:k_in].astype(jnp.int32)             # (B, 1)

    # --- Embedding lookup via one-hot @ table (gather on the MXU) -----------
    iota = jax.lax.broadcasted_iota(jnp.int32, (B, num_pop), 1)
    onehot = (idx == iota).astype(jnp.float32)              # (B, num_pop)
    tbl = slab_ref[r_emb:r_emb + num_pop, :]                # (num_pop, 512), lanes>=pop_dim are 0
    emb = jnp.dot(onehot, tbl[:, :k_in],
                  preferred_element_type=jnp.float32)       # (B, k_in)

    # --- BatchNorm1d(pop_dim): training-mode batch stats, one-pass variance --
    mu = jnp.mean(emb, axis=0, keepdims=True)
    var = jnp.mean(emb * emb, axis=0, keepdims=True) - mu * mu
    emb_n = (emb - mu) * jax.lax.rsqrt(var + EPS)           # padded lanes stay 0

    # concat([BN1(emb), last_weights, last_loss, idx], 1) == emb_n + x by layout.
    cat = emb_n + x                                         # (B, k_in)

    # --- Linear(k_in -> 512): ONE K=k_in MXU dot -----------------------------
    # bn1_gamma pre-folded into W1's pop rows; bn1_beta/b1 are batch-constant
    # and cancel in BN2's mean subtraction; the idx column hits a zero W1 row.
    h = jnp.dot(cat, slab_ref[0:k_in, :],
                preferred_element_type=jnp.float32)         # (B, 512)

    # --- BatchNorm1d(512) + Tanh ---------------------------------------------
    mu2 = jnp.mean(h, axis=0, keepdims=True)
    var2 = jnp.mean(h * h, axis=0, keepdims=True) - mu2 * mu2
    h = (h - mu2) * jax.lax.rsqrt(var2 + EPS)
    h = jnp.tanh(h * slab_ref[r_bn2:r_bn2 + 1, :]
                 + slab_ref[r_bn2 + 1:r_bn2 + 2, :])

    # --- Linear(512 -> n_out): W2 stored transposed, contract on the 512 axis
    w2t = slab_ref[r_w2t:r_w2t + n_pad, :]                  # (n_pad, 512)
    logits = jax.lax.dot_general(
        h, w2t, dimension_numbers=(((1,), (1,)), ((), ())),
        preferred_element_type=jnp.float32)                 # (B, n_pad)
    b2row = slab_ref[r_bn2 + 2:r_bn2 + 3, :]                # bias; lanes>=n_out are -1e30
    logits = logits + b2row[:, :n_pad]

    # --- Softmax(dim=1): padded lanes give exp(-huge)==0; exact normalization
    m = jnp.max(logits, axis=1, keepdims=True)
    e = jnp.exp(logits - m)
    out_ref[...] = e / jnp.sum(e, axis=1, keepdims=True)


def pack_params(params):
    """Fold / pack every static parameter into ONE lane-dense (rows, 512) slab."""
    emb_tbl = params["emb_tbl"]
    num_pop, pop_dim = emb_tbl.shape
    wdim = params["w1_w"].shape[0]
    n_out = params["w2"].shape[1]
    k_in = pop_dim + wdim + 2               # emb | weights | loss | idx
    n_pad = _round_up(n_out, 8)

    r_bn2 = _round_up(k_in, 8)              # 24
    r_w2t = r_bn2 + 8                       # 32
    r_emb = r_w2t + _round_up(n_pad, 8)     # 40
    rows = r_emb + _round_up(num_pop, 8)    # 72

    slab = jnp.zeros((rows, HIDDEN), jnp.float32)

    # W1 block (rows [0:k_in)): bn1_gamma folded into the pop rows; bn1_beta
    # and b1 dropped (cancelled by BN2's batch-mean subtraction).
    g1 = params["bn1_g"].reshape(pop_dim, 1)
    slab = slab.at[0:pop_dim, :].set(params["w1_pop"] * g1)
    slab = slab.at[pop_dim:pop_dim + wdim, :].set(params["w1_w"])
    slab = slab.at[pop_dim + wdim:pop_dim + wdim + 1, :].set(params["w1_l"])
    # row k_in-1 stays zero: it multiplies the popularity-index column.

    # BN2 affine + output bias; pad lanes of the bias row hold -1e30 so the
    # padded softmax lanes are inert.
    slab = slab.at[r_bn2, :].set(params["bn2_g"].reshape(-1))
    slab = slab.at[r_bn2 + 1, :].set(params["bn2_b"].reshape(-1))
    b2row = jnp.full((HIDDEN,), NEG_BIG, jnp.float32).at[:n_out].set(
        params["b2"].reshape(-1))
    slab = slab.at[r_bn2 + 2, :].set(b2row)

    # W2 transposed: (n_out, 512) contiguous rows instead of a strided (512, 6).
    slab = slab.at[r_w2t:r_w2t + n_out, :].set(params["w2"].T)

    # Embedding table in lanes [0:pop_dim) (zero elsewhere).
    slab = slab.at[r_emb:r_emb + num_pop, 0:pop_dim].set(emb_tbl)

    meta = dict(num_pop=num_pop, pop_dim=pop_dim, wdim=wdim, n_out=n_out,
                n_pad=n_pad, k_in=k_in, r_bn2=r_bn2, r_w2t=r_w2t, r_emb=r_emb)
    return {"slab": slab, "meta": meta}


def policy_forward(popularity, last_weights, last_loss, packed):
    """popularity: (B,) int32; last_weights: (B, wdim); last_loss: (B, 1)."""
    meta = packed["meta"]
    B = popularity.shape[0]
    pop_dim, k_in = meta["pop_dim"], meta["k_in"]
    n_out, n_pad = meta["n_out"], meta["n_pad"]

    # Per-sample slab: zeros where the (BN'd) embedding will land in-kernel,
    # then [last_weights | last_loss | popularity-as-f32].
    x_in = jnp.concatenate(
        [jnp.zeros((B, pop_dim), jnp.float32),
         last_weights.astype(jnp.float32),
         last_loss.astype(jnp.float32).reshape(B, 1),
         popularity.astype(jnp.float32).reshape(B, 1)], axis=1)   # (B, k_in)

    kernel = functools.partial(
        _policy_kernel, pop_dim=pop_dim, k_in=k_in, num_pop=meta["num_pop"],
        r_bn2=meta["r_bn2"], r_w2t=meta["r_w2t"], r_emb=meta["r_emb"],
        n_pad=n_pad)

    vmem = pl.BlockSpec(memory_space=pltpu.MemorySpace.VMEM)
    out = pl.pallas_call(
        kernel,
        out_shape=jax.ShapeDtypeStruct((B, n_pad), jnp.float32),
        in_specs=[vmem, vmem],
        out_specs=vmem,
        cost_estimate=pl.CostEstimate(flops=300_000, transcendentals=4_700,
                                      bytes_accessed=149_000),
    )(x_in, packed["slab"])
    return out[:, :n_out]


def init_params(key, num_pop, pop_dim, wdim):
    """Deterministic synthetic init matching the module's parameter shapes."""
    ks = jax.random.split(key, 8)
    in_len = pop_dim + wdim + 1  # Policy_Type == 2
    scale1 = 1.0 / jnp.sqrt(in_len)
    scale2 = 1.0 / jnp.sqrt(HIDDEN)
    w1 = jax.random.uniform(ks[1], (in_len, HIDDEN), jnp.float32, -scale1, scale1)
    return {
        "emb_tbl": jax.random.normal(ks[0], (num_pop, pop_dim), jnp.float32),
        "bn1_g": jnp.ones((1, pop_dim), jnp.float32),
        "bn1_b": jnp.zeros((1, pop_dim), jnp.float32),
        # first Linear's weight, split along its input rows to fold the concat
        "w1_pop": w1[:pop_dim],
        "w1_w":   w1[pop_dim:pop_dim + wdim],
        "w1_l":   w1[pop_dim + wdim:],
        "b1": jax.random.uniform(ks[2], (1, HIDDEN), jnp.float32, -scale1, scale1),
        "bn2_g": jnp.ones((1, HIDDEN), jnp.float32),
        "bn2_b": jnp.zeros((1, HIDDEN), jnp.float32),
        "w2": jax.random.uniform(ks[3], (HIDDEN, len(EMB_SIZE)), jnp.float32,
                                 -scale2, scale2),
        "b2": jax.random.uniform(ks[4], (1, len(EMB_SIZE)), jnp.float32,
                                 -scale2, scale2),
    }


def policy_reference(popularity, last_weights, last_loss, params):
    """Pure-JAX reference of the original PyTorch forward (training-mode BN)."""
    emb = params["emb_tbl"][popularity]
    mu = jnp.mean(emb, axis=0, keepdims=True)
    var = jnp.mean((emb - mu) ** 2, axis=0, keepdims=True)
    emb_n = (emb - mu) / jnp.sqrt(var + EPS) * params["bn1_g"] + params["bn1_b"]
    x = jnp.concatenate([emb_n, last_weights, last_loss], axis=1)
    w1 = jnp.concatenate([params["w1_pop"], params["w1_w"], params["w1_l"]], axis=0)
    h = x @ w1 + params["b1"]
    mu2 = jnp.mean(h, axis=0, keepdims=True)
    var2 = jnp.mean((h - mu2) ** 2, axis=0, keepdims=True)
    h = jnp.tanh((h - mu2) / jnp.sqrt(var2 + EPS) * params["bn2_g"] + params["bn2_b"])
    logits = h @ params["w2"] + params["b2"]
    return jax.nn.softmax(logits, axis=1)


if __name__ == "__main__":
    # Setting_Popularity = (32, 16), Setting_Weight = (_, 6), Policy_Type = 2
    B, NUM_POP, POP_DIM, WDIM = 8, 32, 16, len(EMB_SIZE)

    key = jax.random.PRNGKey(0)
    k_data, k_p = jax.random.split(key)
    k1, k2, k3 = jax.random.split(k_data, 3)

    popularity = jax.random.randint(k1, (B,), 0, NUM_POP, dtype=jnp.int32)
    last_weights = jax.random.normal(k2, (B, WDIM), jnp.float32)
    last_loss = jax.random.normal(k3, (B, 1), jnp.float32)

    params = init_params(k_p, NUM_POP, POP_DIM, WDIM)
    packed = pack_params(params)

    out = policy_forward(popularity, last_weights, last_loss, packed)
    out = jax.block_until_ready(out)

    assert out.shape == (B, len(EMB_SIZE))
    # rows of a softmax must sum to ~1 (exact divide -> tight tolerance)
    assert bool(jnp.all(jnp.abs(jnp.sum(out, axis=1) - 1.0) < 1e-4))
    # match the unfused pure-JAX reference of the original module
    ref = policy_reference(popularity, last_weights, last_loss, params)
    assert bool(jnp.allclose(out, ref, atol=3e-3, rtol=3e-3))
    print("KERNEL_OK")
</pallas_src>

<mosaic_0001>
module attributes {stable_mosaic.version = 11 : i64} {
  func.func @_policy_kernel(%arg0: memref<8x24xf32, #tpu.memory_space<vmem>>, %arg1: memref<72x512xf32, #tpu.memory_space<vmem>>, %arg2: memref<8x8xf32, #tpu.memory_space<vmem>>) attributes {dimension_semantics = [], scalar_prefetch = 0 : i64, scratch_operands = 0 : i64, tpu.core_type = #tpu.core_type<tc>} {
    %c0 = arith.constant 0 : index
    %c0_0 = arith.constant 0 : index
    %0 = vector.load %arg0[%c0, %c0_0] : memref<8x24xf32, #tpu.memory_space<vmem>>, vector<8x24xf32>
    %1 = vector.extract_strided_slice %0 {offsets = [0, 23], sizes = [8, 1], strides = [1, 1]} : vector<8x24xf32> to vector<8x1xf32>
    %2 = arith.fptosi %1 : vector<8x1xf32> to vector<8x1xi32>
    %3 = tpu.iota {dimensions = array<i32: 1>} : vector<8x32xi32>
    %4 = vector.broadcast %2 : vector<8x1xi32> to vector<8x32xi32>
    %5 = arith.cmpi eq, %4, %3 : vector<8x32xi32>
    %6 = arith.extui %5 : vector<8x32xi1> to vector<8x32xi32>
    %7 = arith.sitofp %6 : vector<8x32xi32> to vector<8x32xf32>
    %c40 = arith.constant 40 : index
    %c0_1 = arith.constant 0 : index
    %8 = vector.load %arg1[%c40, %c0_1] : memref<72x512xf32, #tpu.memory_space<vmem>>, vector<32x512xf32>
    %9 = vector.extract_strided_slice %8 {offsets = [0, 0], sizes = [32, 24], strides = [1, 1]} : vector<32x512xf32> to vector<32x24xf32>
    %cst = arith.constant dense<0.000000e+00> : vector<8x24xf32>
    %10 = tpu.matmul %7, %9, %cst {dimension_numbers = #tpu.dot_dimension_numbers<[1], [0], [0], [1], [0, 0, 1, 1], [], []>} : vector<8x32xf32>, vector<32x24xf32>, vector<8x24xf32> -> vector<8x24xf32>
    %cst_2 = arith.constant dense<0.000000e+00> : vector<24xf32>
    %11 = vector.multi_reduction <add>, %10, %cst_2 [0] : vector<8x24xf32> to vector<24xf32>
    %12 = vector.shape_cast %11 : vector<24xf32> to vector<1x24xf32>
    %cst_3 = arith.constant 8.000000e+00 : f32
    %13 = vector.broadcast %cst_3 : f32 to vector<1x24xf32>
    %14 = arith.divf %12, %13 : vector<1x24xf32>
    %15 = arith.mulf %10, %10 : vector<8x24xf32>
    %cst_4 = arith.constant dense<0.000000e+00> : vector<24xf32>
    %16 = vector.multi_reduction <add>, %15, %cst_4 [0] : vector<8x24xf32> to vector<24xf32>
    %17 = vector.shape_cast %16 : vector<24xf32> to vector<1x24xf32>
    %cst_5 = arith.constant 8.000000e+00 : f32
    %18 = vector.broadcast %cst_5 : f32 to vector<1x24xf32>
    %19 = arith.divf %17, %18 : vector<1x24xf32>
    %20 = arith.mulf %14, %14 : vector<1x24xf32>
    %21 = arith.subf %19, %20 : vector<1x24xf32>
    %22 = vector.broadcast %14 : vector<1x24xf32> to vector<8x24xf32>
    %23 = arith.subf %10, %22 : vector<8x24xf32>
    %cst_6 = arith.constant 9.99999974E-6 : f32
    %24 = vector.broadcast %cst_6 : f32 to vector<1x24xf32>
    %25 = arith.addf %21, %24 : vector<1x24xf32>
    %26 = math.rsqrt %25 : vector<1x24xf32>
    %27 = vector.broadcast %26 : vector<1x24xf32> to vector<8x24xf32>
    %28 = arith.mulf %23, %27 : vector<8x24xf32>
    %29 = arith.addf %28, %0 : vector<8x24xf32>
    %c0_7 = arith.constant 0 : index
    %c0_8 = arith.constant 0 : index
    %30 = vector.load %arg1[%c0_7, %c0_8] : memref<72x512xf32, #tpu.memory_space<vmem>>, vector<24x512xf32>
    %cst_9 = arith.constant dense<0.000000e+00> : vector<8x512xf32>
    %31 = tpu.matmul %29, %30, %cst_9 {dimension_numbers = #tpu.dot_dimension_numbers<[1], [0], [0], [1], [0, 0, 1, 1], [], []>} : vector<8x24xf32>, vector<24x512xf32>, vector<8x512xf32> -> vector<8x512xf32>
    %cst_10 = arith.constant dense<0.000000e+00> : vector<512xf32>
    %32 = vector.multi_reduction <add>, %31, %cst_10 [0] : vector<8x512xf32> to vector<512xf32>
    %33 = vector.shape_cast %32 : vector<512xf32> to vector<1x512xf32>
    %cst_11 = arith.constant 8.000000e+00 : f32
    %34 = vector.broadcast %cst_11 : f32 to vector<1x512xf32>
    %35 = arith.divf %33, %34 : vector<1x512xf32>
    %36 = arith.mulf %31, %31 : vector<8x512xf32>
    %cst_12 = arith.constant dense<0.000000e+00> : vector<512xf32>
    %37 = vector.multi_reduction <add>, %36, %cst_12 [0] : vector<8x512xf32> to vector<512xf32>
    %38 = vector.shape_cast %37 : vector<512xf32> to vector<1x512xf32>
    %cst_13 = arith.constant 8.000000e+00 : f32
    %39 = vector.broadcast %cst_13 : f32 to vector<1x512xf32>
    %40 = arith.divf %38, %39 : vector<1x512xf32>
    %41 = arith.mulf %35, %35 : vector<1x512xf32>
    %42 = arith.subf %40, %41 : vector<1x512xf32>
    %43 = vector.broadcast %35 : vector<1x512xf32> to vector<8x512xf32>
    %44 = arith.subf %31, %43 : vector<8x512xf32>
    %cst_14 = arith.constant 9.99999974E-6 : f32
    %45 = vector.broadcast %cst_14 : f32 to vector<1x512xf32>
    %46 = arith.addf %42, %45 : vector<1x512xf32>
    %47 = math.rsqrt %46 : vector<1x512xf32>
    %48 = vector.broadcast %47 : vector<1x512xf32> to vector<8x512xf32>
    %49 = arith.mulf %44, %48 : vector<8x512xf32>
    %c24 = arith.constant 24 : index
    %c0_15 = arith.constant 0 : index
    %50 = vector.load %arg1[%c24, %c0_15] : memref<72x512xf32, #tpu.memory_space<vmem>>, vector<1x512xf32>
    %51 = vector.broadcast %50 : vector<1x512xf32> to vector<8x512xf32>
    %52 = arith.mulf %49, %51 : vector<8x512xf32>
    %c25 = arith.constant 25 : index
    %c0_16 = arith.constant 0 : index
    %53 = vector.load %arg1[%c25, %c0_16] : memref<72x512xf32, #tpu.memory_space<vmem>>, vector<1x512xf32>
    %54 = vector.broadcast %53 : vector<1x512xf32> to vector<8x512xf32>
    %55 = arith.addf %52, %54 : vector<8x512xf32>
    %56 = math.tanh %55 : vector<8x512xf32>
    %c32 = arith.constant 32 : index
    %c0_17 = arith.constant 0 : index
    %57 = vector.load %arg1[%c32, %c0_17] : memref<72x512xf32, #tpu.memory_space<vmem>>, vector<8x512xf32>
    %cst_18 = arith.constant dense<0.000000e+00> : vector<8x8xf32>
    %58 = tpu.matmul %56, %57, %cst_18 {dimension_numbers = #tpu.dot_dimension_numbers<[1], [1], [0], [0], [0, 0, 1, 0], [], []>} : vector<8x512xf32>, vector<8x512xf32>, vector<8x8xf32> -> vector<8x8xf32>
    %c26 = arith.constant 26 : index
    %c0_19 = arith.constant 0 : index
    %59 = vector.load %arg1[%c26, %c0_19] : memref<72x512xf32, #tpu.memory_space<vmem>>, vector<1x512xf32>
    %60 = vector.extract_strided_slice %59 {offsets = [0, 0], sizes = [1, 8], strides = [1, 1]} : vector<1x512xf32> to vector<1x8xf32>
    %61 = vector.broadcast %60 : vector<1x8xf32> to vector<8x8xf32>
    %62 = arith.addf %58, %61 : vector<8x8xf32>
    %cst_20 = arith.constant dense<0xFF800000> : vector<8xf32>
    %63 = vector.multi_reduction <maximumf>, %62, %cst_20 [1] : vector<8x8xf32> to vector<8xf32>
    %64 = vector.shape_cast %63 : vector<8xf32> to vector<8x1xf32>
    %65 = vector.broadcast %64 : vector<8x1xf32> to vector<8x8xf32>
    %66 = arith.subf %62, %65 : vector<8x8xf32>
    %67 = math.exp %66 : vector<8x8xf32>
    %cst_21 = arith.constant dense<0.000000e+00> : vector<8xf32>
    %68 = vector.multi_reduction <add>, %67, %cst_21 [1] : vector<8x8xf32> to vector<8xf32>
    %69 = vector.shape_cast %68 : vector<8xf32> to vector<8x1xf32>
    %70 = vector.broadcast %69 : vector<8x1xf32> to vector<8x8xf32>
    %71 = arith.divf %67, %70 : vector<8x8xf32>
    %c0_22 = arith.constant 0 : index
    %c0_23 = arith.constant 0 : index
    %72 = vector.load %arg2[%c0_22, %c0_23] : memref<8x8xf32, #tpu.memory_space<vmem>>, vector<8x8xf32>
    tpu.vector_store %arg2[%c0_22, %c0_23], %71 {strides = array<i32>} : memref<8x8xf32, #tpu.memory_space<vmem>>, vector<8x8xf32>,
    return
  }
}

</mosaic_0001>

<bundles_post_ra>
// kernel: tpu_custom_call.1
= control target key start
LH: loop header
LB: loop body
LE: loop exit
PB: predicated region body
PF: predicated region fallthrough
CT: control target
= control target key end

     0   :  { %7 = vsyncpa [#allocation3], 0  ;;  %s832_s0 = inlined_call_operand.hbm [shape: f32[8,24], index: 0, kind: input, shape index: {}]   ;;  %s833_s1 = inlined_call_operand.hbm [shape: f32[72,512], index: 1, kind: input, shape index: {}]   ;;  %s834_s2 = inlined_call_operand.hbm [shape: f32[8,8], index: 2, kind: output, shape index: {}]  }
   0x1   :  { %8 = vsyncpa [#allocation6], 0 }
   0x2   :  { %9 = vsyncpa [#allocation4], 0  ;;  %s751_s9 = smov [#allocation2]   ;;  %s752_s11 = smov [#allocation5]  }
   0x3   :  { %s16_s10 = sshll.u32 %s751_s9, 4  ;;  %s25_s12 = sshll.u32 %s752_s11, 4  ;;  %s17_s10 = int_to_ptr.vmem [resolvable:$true] %s16_s10  ;;  %s26_s12 = int_to_ptr.vmem [resolvable:$true] %s25_s12 }
   0x4   :  { %s693_s13 = scalar_lea.vmem %s17_s10, 128  ;;  %p698_p1 = scmp.lt.s32.totalorder %s17_s10, %s17_s10 }
   0x5   :  { %p694_p0 = scmp.ne.s32.totalorder %s17_s10, %s693_s13  ;;  %p699_p2 = scmp.lt.s32.totalorder %s693_s13, %s693_s13 }
   0x7   :  { %p700_p3 = por %p699_p2, %p698_p1 }
   0x9   :  { %p701_p4 = pnand %p700_p3, %p694_p0 }
   0xb   :  { %704 = shalt.err (!%p701_p4)
}
   0xc   :  { %19 = dma.hbm_to_vmem [thread:$0]  %s832_s0, 128, %s17_s10, [#allocation3]  }
   0xd   :  { %s713_s16 = scalar_lea.vmem %s26_s12, 4608  ;;  %p718_p6 = scmp.lt.s32.totalorder %s26_s12, %s26_s12 }
   0xe   :  { %p714_p5 = scmp.ne.s32.totalorder %s26_s12, %s713_s16  ;;  %p719_p7 = scmp.lt.s32.totalorder %s713_s16, %s713_s16 }
  0x10   :  { %p720_p8 = por %p719_p7, %p718_p6 }
  0x12   :  { %p721_p9 = pnand %p720_p8, %p714_p5 }
  0x14   :  { %724 = shalt.err (!%p721_p9)
}
  0x15   :  { %s753_s17 = smov 512   ;;  %s754_s18 = smov 32  }
  0x16   :  { %31 = dma.hbm_to_vmem [thread:$0]  %s833_s1, 4608, %s26_s12, [#allocation6], %s753_s17, %s753_s17, %s754_s18  }
  0x17   :  { %745 = dma.done.wait [#allocation3], 128  }
  0x18   :  { %746 = vsyncadd [#allocation3], 4294967168 }
  0x19   :  { %747 = dma.done.wait [#allocation6], 4608  }
  0x1a   :  { %748 = vsyncadd [#allocation6], 4294962688  ;;  %v755_v0 = vmov 23   ;;  %v756_v1 = vmov 0.0   ;;  %v782_v2 = vld [vmem:[#allocation2] sm:$0xff]  ;;  %v51_v3 = vld [vmem:[#allocation5 + $0x100] sm:$0xff]  ;;  %v40_v9 = vlaneseq }
  0x1b   :  { %662 = vset.pattern.permute.xlu0 %v755_v0  ;;  %641 = vmatprep.subr.mxu0 %v756_v1  ;;  %v50_v4 = vld [vmem:[#allocation5 + $0xe0] sm:$0xff]  ;;  %v652_v5 = vtrunc.f32 %v782_v2  ;;  %vm757_vm0 = vmmov 0   ;;  %vm52_vm1 = vcmask 261120   ;;  %v161_v13 = vld [vmem:[#allocation5 + $0x48] sm:$0xff]  ;;  %v163_v19 = vld [vmem:[#allocation5 + $0x58] sm:$0xff]  ;;  %vm126_vm3 = vcmask 195584  }
  0x1c   :  { %231 = vmatprep.mubr.f32.mxu1 %v756_v1  ;;  %642 = vmatpush3.msra.mxu0 %v51_v3  ;;  %v49_v6 = vld [vmem:[#allocation5 + $0xc0] sm:$0xff]  ;;  %v41_v10 = vand.u32 127, %v40_v9  ;;  %v157_v15 = vld [vmem:[#allocation5 + $0x28] sm:$0xff]  ;;  %v162_v46 = vld [vmem:[#allocation5 + $0x50] sm:$0xff]  ;;  %vm603_vm4 = vcmask 64512   ;;  %s758_s0 = smov [#allocation7]  }
  0x1d   :  { %643 = vmatprep.subr.mxu0 %v756_v1  ;;  %649 = vmatprep.mubr.msk.f32.mxu0 %vm757_vm0, %v756_v1  ;;  %v653_v7 = vcvt.f32.s32 %v652_v5  ;;  %v48_v8 = vld [vmem:[#allocation5 + $0xa0] sm:$0xff]  ;;  %v153_v17 = vld [vmem:[#allocation5 + $0x8] sm:$0xff]  ;;  %v159_v47 = vld [vmem:[#allocation5 + $0x38] sm:$0xff]  ;;  %s622_s1 = sshll.u32 %s758_s0, 4  ;;  %s623_s1 = int_to_ptr.vmem [resolvable:$true] %s622_s1 }
  0x1e   :  { %644 = vmatpush3.msra.mxu0 %v50_v4  ;;  %193 = vmatprep.subr.mxu1 %v161_v13  ;;  %v160_v14 = vld [vmem:[#allocation5 + $0x40] sm:$0xff]  ;;  %v158_v48 = vld [vmem:[#allocation5 + $0x30] sm:$0xff]  ;;  %v155_v49 = vld [vmem:[#allocation5 + $0x18] sm:$0xff]  ;;  %s725_s21 = scalar_lea.vmem %s623_s1, 128  ;;  %p730_p11 = scmp.lt.s32.totalorder %s623_s1, %s623_s1 }
  0x1f   :  { %645 = vmatprep.subr.mxu0 %v756_v1  ;;  %43 = vperm.xlu0 %662, %v653_v7   ;;  %v156_v16 = vld [vmem:[#allocation5 + $0x20] sm:$0xff]  ;;  %v154_v50 = vld [vmem:[#allocation5 + $0x10] sm:$0xff]  ;;  %v452_v51 = vld [vmem:[#allocation5 + $0x88] sm:$0xff]  ;;  %p726_p10 = scmp.ne.s32.totalorder %s623_s1, %s725_s21  ;;  %p731_p12 = scmp.lt.s32.totalorder %s725_s21, %s725_s21 }
  0x20   :  { %646 = vmatpush3.msra.mxu0 %v49_v6  ;;  %194 = vmatpush1.msra.mxu1 %v160_v14  ;;  %v152_v18 = vld [vmem:[#allocation5] sm:$0xff]  ;;  %v454_v53 = vld [vmem:[#allocation5 + $0x98] sm:$0xff] }
  0x21   :  { %647 = vmatprep.subr.mxu0 %v756_v1  ;;  %195 = vmatprep.subr.mxu1 %v157_v15  ;;  %v451_v52 = vld [vmem:[#allocation5 + $0x80] sm:$0xff]  ;;  %p732_p13 = por %p731_p12, %p730_p11 }
  0x22   :  { %648 = vmatpush3.msra.mxu0 %v48_v8  ;;  %196 = vmatpush1.msra.mxu1 %v156_v16 }
  0x23   :  { %197 = vmatprep.subr.mxu1 %v153_v17  ;;  %493 = vmatprep.subr.mxu0 %v452_v51  ;;  %p733_p0 = pnand %p732_p13, %p726_p10 }
  0x24   :  { %198 = vmatpush1.msra.mxu1 %v152_v18 }
  0x25   :  { %264 = vmatprep.subr.mxu1 %v163_v19 }
  0x9a   :  { %v44_v11 = vpop.permute.xlu0 %43 }
  0x9b   :  { %vm45_vm2 = vcmp.eq.s32.totalorder %v44_v11, %v41_v10 }
  0x9c   :  { %v632_v12 = vsel %vm45_vm2, 1.0, %v756_v1 }
  0x9d   :  { %650 = vmatmul.mubr.msk.f32.vlgmr.msra.gmra.mxu0 %vm52_vm1, %v632_v12 }
  0x9e   :  { %494 = vmatpush1.xpose.msra.mxu0 %v451_v52 }
  0x9f   :  { %563 = vmatprep.subr.mxu0 %v454_v53 }
 0x15d   :  { %v122_v20 = vpop.f32.mrf.mxu0 }
 0x15e   :  { %v127_v21 = vsel %vm126_vm3, %v122_v20, 0.0  ;;  %v136_v22 = vmul.f32 %v122_v20, %v122_v20 }
 0x15f   :  { %v128_v23 = vrot.slane %v127_v21, 4  ;;  %v651_v24 = vpop.f32.mrf.mxu0 }
 0x160   :  { %v137_v25 = vsel %vm126_vm3, %v136_v22, 0.0 }
 0x161   :  { %v129_v26 = vadd.f32 %v128_v23, %v127_v21  ;;  %v138_v27 = vrot.slane %v137_v25, 4 }
 0x163   :  { %v130_v28 = vrot.slane %v129_v26, 2  ;;  %v139_v29 = vadd.f32 %v138_v27, %v137_v25 }
 0x165   :  { %v131_v30 = vadd.f32 %v130_v28, %v129_v26  ;;  %v140_v31 = vrot.slane %v139_v29, 2 }
 0x167   :  { %v132_v32 = vrot.slane %v131_v30, 1  ;;  %v141_v33 = vadd.f32 %v140_v31, %v139_v29 }
 0x169   :  { %v133_v34 = vadd.f32 %v132_v32, %v131_v30  ;;  %v142_v35 = vrot.slane %v141_v33, 1 }
 0x16b   :  { %v135_v36 = vmul.f32 0.125, %v133_v34  ;;  %v143_v37 = vadd.f32 %v142_v35, %v141_v33 }
 0x16d   :  { %v144_v38 = vmul.f32 0.125, %v143_v37  ;;  %v145_v39 = vmul.f32 %v135_v36, %v135_v36  ;;  %v147_v42 = vsub.f32 %v122_v20, %v135_v36 }
 0x16f   :  { %v146_v40 = vsub.f32 %v144_v38, %v145_v39 }
 0x171   :  { %v148_v41 = vadd.f32 1e-05, %v146_v40 }
 0x173   :  { %663 = vrsqrt.f32 %v148_v41 }
 0x180   :  { %v664_v43 = vpop.eup %663 }
 0x181   :  { %v150_v44 = vmul.f32 %v664_v43, %v147_v42 }
 0x183   :  { %v151_v45 = vadd.f32 %v150_v44, %v782_v2 }
 0x185   :  { %634 = vmatmul.mubr.msk.f32.vlgmr.msra.gmra.mxu1 %vm126_vm3, %v151_v45 }
 0x186   :  { %265 = vmatpush1.msra.mxu1 %v162_v46  ;;  %302 = vmatprep.mubr.f32.mxu1 %v756_v1 }
 0x187   :  { %266 = vmatprep.subr.mxu1 %v159_v47 }
 0x188   :  { %267 = vmatpush1.msra.mxu1 %v158_v48 }
 0x189   :  { %268 = vmatprep.subr.mxu1 %v155_v49 }
 0x18a   :  { %269 = vmatpush1.msra.mxu1 %v154_v50 }
 0x18b   :  { %635 = vmatmul.mubr.msk.f32.vlgmr.msra.gmra.mxu1 %vm126_vm3, %v151_v45 }
 0x245   :  { %v797_v54 = vpop.f32.mrf.mxu1 }
 0x246   :  { %v309_v55 = vrot.slane %v797_v54, 4  ;;  %v337_v56 = vmul.f32 %v797_v54, %v797_v54 }
 0x247   :  { %v802_v57 = vpop.f32.mrf.mxu1 }
 0x248   :  { %v310_v58 = vadd.f32 %v309_v55, %v797_v54  ;;  %v341_v59 = vrot.slane %v337_v56, 4  ;;  %v315_v60 = vrot.slane %v802_v57, 4  ;;  %v338_v61 = vmul.f32 %v802_v57, %v802_v57 }
 0x24a   :  { %v311_v62 = vrot.slane %v310_v58, 2  ;;  %v342_v63 = vadd.f32 %v341_v59, %v337_v56  ;;  %v316_v0 = vadd.f32 %v315_v60, %v802_v57  ;;  %v347_v1 = vrot.slane %v338_v61, 4 }
 0x24b   :  { %v809_v2 = vpop.f32.mrf.mxu1 }
 0x24c   :  { %v312_v3 = vadd.f32 %v311_v62, %v310_v58  ;;  %v343_v4 = vrot.slane %v342_v63, 2  ;;  %v317_v5 = vrot.slane %v316_v0, 2  ;;  %v348_v6 = vadd.f32 %v347_v1, %v338_v61 }
 0x24d   :  { %v321_v7 = vrot.slane %v809_v2, 4  ;;  %v339_v8 = vmul.f32 %v809_v2, %v809_v2  ;;  %v814_v10 = vpop.f32.mrf.mxu1 }
 0x24e   :  { %v313_v11 = vrot.slane %v312_v3, 1  ;;  %v344_v12 = vadd.f32 %v343_v4, %v342_v63  ;;  %v318_v13 = vadd.f32 %v317_v5, %v316_v0  ;;  %v349_v14 = vrot.slane %v348_v6, 2 }
 0x24f   :  { %v322_v15 = vadd.f32 %v321_v7, %v809_v2  ;;  %v353_v16 = vrot.slane %v339_v8, 4  ;;  %v327_v17 = vrot.slane %v814_v10, 4  ;;  %v340_v18 = vmul.f32 %v814_v10, %v814_v10 }
 0x250   :  { %v314_v19 = vadd.f32 %v313_v11, %v312_v3  ;;  %v345_v20 = vrot.slane %v344_v12, 1  ;;  %v319_v21 = vrot.slane %v318_v13, 1  ;;  %v350_v22 = vadd.f32 %v349_v14, %v348_v6 }
 0x251   :  { %v323_v23 = vrot.slane %v322_v15, 2  ;;  %v354_v24 = vadd.f32 %v353_v16, %v339_v8  ;;  %v328_v25 = vadd.f32 %v327_v17, %v814_v10  ;;  %v359_v26 = vrot.slane %v340_v18, 4  ;;  %v394_v8 = vld [vmem:[#allocation5 + $0x60] ss:$8 sm:$0xf] }
 0x252   :  { %v333_v27 = vmul.f32 0.125, %v314_v19  ;;  %v346_v28 = vadd.f32 %v345_v20, %v344_v12  ;;  %v320_v29 = vadd.f32 %v319_v21, %v318_v13  ;;  %v351_v30 = vrot.slane %v350_v22, 1 }
 0x253   :  { %v324_v31 = vadd.f32 %v323_v23, %v322_v15  ;;  %v355_v32 = vrot.slane %v354_v24, 2  ;;  %v329_v33 = vrot.slane %v328_v25, 2  ;;  %v360_v34 = vadd.f32 %v359_v26, %v340_v18  ;;  %v421_v15 = vld [vmem:[#allocation5 + $0x61] ss:$8 sm:$0xf] }
 0x254   :  { %v365_v35 = vmul.f32 0.125, %v346_v28  ;;  %v369_v36 = vmul.f32 %v333_v27, %v333_v27  ;;  %v334_v37 = vmul.f32 0.125, %v320_v29  ;;  %v352_v38 = vadd.f32 %v351_v30, %v350_v22 }
 0x255   :  { %v325_v39 = vrot.slane %v324_v31, 1  ;;  %v356_v40 = vadd.f32 %v355_v32, %v354_v24  ;;  %v330_v41 = vadd.f32 %v329_v33, %v328_v25  ;;  %v361_v44 = vrot.slane %v360_v34, 2 }
 0x256   :  { %v373_v42 = vsub.f32 %v365_v35, %v369_v36  ;;  %v370_v43 = vmul.f32 %v334_v37, %v334_v37  ;;  %v366_v45 = vmul.f32 0.125, %v352_v38  ;;  %v397_v0 = vshrl.u32 %v40_v9, 7 }
 0x257   :  { %v326_v46 = vadd.f32 %v325_v39, %v324_v31  ;;  %v357_v47 = vrot.slane %v356_v40, 1  ;;  %v331_v48 = vrot.slane %v330_v41, 1  ;;  %v362_v50 = vadd.f32 %v361_v44, %v360_v34 }
 0x258   :  { %v381_v49 = vadd.f32 1e-05, %v373_v42  ;;  %v374_v51 = vsub.f32 %v366_v45, %v370_v43  ;;  %v398_v6 = vsub.s32 0, %v397_v0  ;;  %v402_v11 = vsub.s32 1, %v397_v0 }
 0x259   :  { %v335_v52 = vmul.f32 0.125, %v326_v46  ;;  %v358_v53 = vadd.f32 %v357_v47, %v356_v40  ;;  %v332_v55 = vadd.f32 %v331_v48, %v330_v41  ;;  %v363_v56 = vrot.slane %v362_v50, 1  ;;  %v453_v40 = vld [vmem:[#allocation5 + $0x90] sm:$0xff] }
 0x25a   :  { %665 = vrsqrt.f32 %v381_v49  ;;  %v382_v58 = vadd.f32 1e-05, %v374_v51  ;;  %v377_v12 = vsub.f32 %v797_v54, %v333_v27  ;;  %v399_v13 = vrot.slane %v394_v8, %v398_v6  ;;  %v456_v43 = vld [vmem:[#allocation5 + $0x62] ss:$8 sm:$0xf] }
 0x25b   :  { %v367_v59 = vmul.f32 0.125, %v358_v53  ;;  %v371_v60 = vmul.f32 %v335_v52, %v335_v52  ;;  %v336_v61 = vmul.f32 0.125, %v332_v55  ;;  %v364_v62 = vadd.f32 %v363_v56, %v362_v50 }
 0x25c   :  { %667 = vrsqrt.f32 %v382_v58  ;;  %v378_v17 = vsub.f32 %v802_v57, %v334_v37  ;;  %v403_v18 = vrot.slane %v394_v8, %v402_v11  ;;  %v406_v9 = vsub.s32 2, %v397_v0 }
 0x25d   :  { %v375_v63 = vsub.f32 %v367_v59, %v371_v60  ;;  %v368_v1 = vmul.f32 0.125, %v364_v62  ;;  %v372_v3 = vmul.f32 %v336_v61, %v336_v61  ;;  %v426_v21 = vrot.slane %v421_v15, %v398_v6 }
 0x25e   :  { %v430_v23 = vrot.slane %v421_v15, %v402_v11  ;;  %v410_v24 = vsub.s32 3, %v397_v0  ;;  %v379_v26 = vsub.f32 %v809_v2, %v335_v52  ;;  %v407_v28 = vrot.slane %v394_v8, %v406_v9 }
 0x25f   :  { %v383_v4 = vadd.f32 1e-05, %v375_v63  ;;  %v376_v5 = vsub.f32 %v368_v1, %v372_v3  ;;  %v380_v31 = vsub.f32 %v814_v10, %v336_v61  ;;  %v434_v34 = vrot.slane %v421_v15, %v406_v9 }
 0x260   :  { %v411_v32 = vrot.slane %v394_v8, %v410_v24  ;;  %v438_v36 = vrot.slane %v421_v15, %v410_v24  ;;  %v461_v45 = vrot.slane %v456_v43, %v398_v6 }
 0x261   :  { %669 = vrsqrt.f32 %v383_v4  ;;  %v384_v7 = vadd.f32 1e-05, %v376_v5 }
 0x263   :  { %671 = vrsqrt.f32 %v384_v7 }
 0x267   :  { %v666_v14 = vpop.eup %665 }
 0x268   :  { %v389_v16 = vmul.f32 %v666_v14, %v377_v12 }
 0x269   :  { %v668_v19 = vpop.eup %667 }
 0x26a   :  { %v416_v20 = vmul.f32 %v399_v13, %v389_v16  ;;  %v390_v22 = vmul.f32 %v668_v19, %v378_v17 }
 0x26c   :  { %v417_v25 = vmul.f32 %v403_v18, %v390_v22  ;;  %v443_v54 = vadd.f32 %v426_v21, %v416_v20 }
 0x26e   :  { %v670_v29 = vpop.eup %669  ;;  %v444_v27 = vadd.f32 %v430_v23, %v417_v25 }
 0x26f   :  { %v391_v30 = vmul.f32 %v670_v29, %v379_v26 }
 0x270   :  { %v672_v57 = vpop.eup %671  ;;  %673 = vtanh.f32 %v444_v27 }
 0x271   :  { %v418_v33 = vmul.f32 %v407_v28, %v391_v30  ;;  %675 = vtanh.f32 %v443_v54  ;;  %v392_v35 = vmul.f32 %v672_v57, %v380_v31 }
 0x273   :  { %v419_v37 = vmul.f32 %v411_v32, %v392_v35  ;;  %v445_v38 = vadd.f32 %v434_v34, %v418_v33 }
 0x275   :  { %v446_v39 = vadd.f32 %v438_v36, %v419_v37 }
 0x277   :  { %677 = vtanh.f32 %v446_v39 }
 0x278   :  { %679 = vtanh.f32 %v445_v38 }
 0x27d   :  { %v674_v2 = vpop.eup %673 }
 0x27e   :  { %v676_v41 = vpop.eup %675  ;;  %527 = vmatprep.mubr.f32.mxu0 %v674_v2 }
 0x27f   :  { %528 = vmatmul.mubr.f32.vlgmr.msra.gmra.mxu0 %v676_v41 }
 0x280   :  { %564 = vmatpush1.xpose.msra.mxu0 %v453_v40 }
 0x284   :  { %v678_v10 = vpop.eup %677 }
 0x285   :  { %v680_v42 = vpop.eup %679  ;;  %597 = vmatprep.mubr.f32.mxu0 %v678_v10 }
 0x286   :  { %598 = vmatmul.mubr.f32.vlgmr.msra.gmra.mxu0 %v680_v42 }
 0x33f   :  { %v529_v44 = vpop.f32.mrf.mxu0 }
 0x340   :  { %v530_v47 = vadd.f32 %v529_v44, %v461_v45 }
 0x341   :  { %v531_v46 = vpop.f32.mrf.mxu0 }
 0x346   :  { %v599_v48 = vpop.f32.mrf.mxu0 }
 0x347   :  { %v600_v49 = vadd.f32 %v599_v48, %v530_v47 }
 0x348   :  { %v601_v50 = vpop.f32.mrf.mxu0 }
 0x349   :  { %v604_v51 = vsel %vm603_vm4, %v600_v49, -inf }
 0x34a   :  { %605 = vmax.xlane.f32.xlu0 %v604_v51 }
 0x3d3   :  { %v606_v52 = vpop.xlane.xlu0 %605 }
 0x3d4   :  { %v607_v53 = vsub.f32 %v600_v49, %v606_v52 }
 0x3d6   :  { %v608_v55 = vmul.f32 1.442695, %v607_v53 }
 0x3d8   :  { %681 = vpow2.f32 %v608_v55 }
 0x3e5   :  { %v682_v56 = vpop.eup %681 }
 0x3e6   :  { %v610_v58 = vsel %vm603_vm4, %v682_v56, 0.0 }
 0x3e7   :  { %611 = vadd.xlane.f32.xlu1 %v610_v58 }
 0x470   :  { %v612_v59 = vpop.xlane.xlu1 %611 }
 0x471   :  { %683 = vrcp.f32 %v612_v59 }
 0x47e   :  { %v684_v60 = vpop.eup %683 }
 0x47f   :  { %v614_v61 = vmul.f32 %v684_v60, %v682_v56 }
 0x481   :  { %615 = vst.msk [vmem:[#allocation7] sm:$0xff] %vm603_vm4, %v614_v61 }
 0x482   :  { %736 = shalt.err (!%p733_p0)
}
 0x483   :  { %625 = dma.vmem_to_hbm [thread:$0]  %s623_s1, 128, %s834_s2, [#allocation4]  }
 0x484   :  { %749 = dma.done.wait [#allocation4], 128  }
 0x485   :  { %750 = vsyncadd [#allocation4], 4294967168 }
 0x486   :  { %629 = vsyncpa [#allocation3], 1 }
 0x487   :  { %630 = vsyncpa [#allocation6], 1 }
 0x488   :  { %631 = vsyncpa [#allocation4], 1 }

</bundles_post_ra>
